<compile_context>
chip_gen: v5e
topology: v5e:2x2
jax: 0.10.0
libtpu: 0.0.40
codegen_flags: <defaults>
</compile_context>

<pallas_src>
import functools

import jax
import jax.numpy as jnp
from jax.experimental import pallas as pl
from jax.experimental.pallas import tpu as pltpu

MARGIN = 1.0
AUX_WEIGHT = 0.4
LANES = 128
SUBLANES = 8
MAX_TILE_ROWS = 2048          # (tile_rows, 128) f32 block = 1 MiB per input
NUM_CORE_SPLITS = 2           # leading "parallel" grid axis (v7x megacore)


def _round_up(x, m):
    return -(-x // m) * m


def _loss_kernel(d_ref, ad_ref, y_ref, ay_ref, out_ref, *,
                 batch, tile_rows, tiles_per_core):
    """Fused contrastive + aux-head loss partial sums.

    d_ref/ad_ref/y_ref/ay_ref : (tile_rows, 128) blocks of the four inputs.
    out_ref                   : (tile_rows, 128) f32 per-core partial-sum block
                                (resident accumulator across the inner axis).
    """
    c = pl.program_id(0)   # parallel (core-split) axis
    i = pl.program_id(1)   # arbitrary (reduction) axis

    @pl.when(i == 0)
    def _init():
        out_ref[...] = jnp.zeros_like(out_ref)

    d = d_ref[...].astype(jnp.float32)
    ad = ad_ref[...].astype(jnp.float32)
    yl = y_ref[...].astype(jnp.float32)
    ayl = ay_ref[...].astype(jnp.float32)

    hinge = jnp.maximum(MARGIN - d, 0.0)
    aux_hinge = jnp.maximum(MARGIN - ad, 0.0)
    per = (yl * d * d + (1.0 - yl) * hinge * hinge
           + AUX_WEIGHT * (ayl * ad * ad + (1.0 - ayl) * aux_hinge * aux_hinge))

    # Mask against the true batch size using the LOGICAL (unclamped) tile
    # index: covers the padded tail, Pallas partial-block reads, and fully
    # duplicated (clamped) tiles, which all contribute exactly 0.
    base = (c * tiles_per_core + i) * (tile_rows * LANES)
    row = jax.lax.broadcasted_iota(jnp.int32, (tile_rows, LANES), 0)
    lane = jax.lax.broadcasted_iota(jnp.int32, (tile_rows, LANES), 1)
    mask = (base + row * LANES + lane) < batch

    out_ref[...] += jnp.where(mask, per, 0.0)


def inception_v3_loss(distance, aux_distance, y, aux_y, *, max_tile_rows=MAX_TILE_ROWS):
    """Contrastive loss + 0.4 * aux contrastive loss (InceptionV3-style aux head).

    distance, aux_distance, y, aux_y: 1-D arrays of shape (B,) (f32 or bf16).
    Returns a scalar float32 loss.
    """
    distance = jnp.asarray(distance)
    aux_distance = jnp.asarray(aux_distance)
    y = jnp.asarray(y)
    aux_y = jnp.asarray(aux_y)

    b = int(distance.shape[0])
    chunk = SUBLANES * LANES                       # 1024
    b_pad = _round_up(b, chunk)
    rows = b_pad // LANES                          # multiple of 8
    tile_rows = min(_round_up(max_tile_rows, SUBLANES), rows)
    num_tiles = -(-rows // tile_rows)
    tiles_per_core = -(-num_tiles // NUM_CORE_SPLITS)

    def prep(x):
        x = x.reshape(-1)
        if b_pad != b:
            # Minimal zero-pad to the 1024 boundary; masked off in-kernel.
            x = jnp.pad(x, (0, b_pad - b))
        return x.reshape(rows, LANES)              # free metadata reshape if b % 1024 == 0

    ins = [prep(distance), prep(aux_distance), prep(y), prep(aux_y)]

    def in_map(c, i):
        # Clamp so a (possibly) extra grid step on the second core re-reads the
        # last real tile; the kernel fully masks it (contributes 0).
        blk = jnp.minimum(c * tiles_per_core + i, num_tiles - 1)
        return (blk, 0)

    kernel = functools.partial(
        _loss_kernel, batch=b, tile_rows=tile_rows, tiles_per_core=tiles_per_core)

    bytes_in = sum(int(x.size) * x.dtype.itemsize for x in ins)
    out_elems = NUM_CORE_SPLITS * tile_rows * LANES

    partials = pl.pallas_call(
        kernel,
        out_shape=jax.ShapeDtypeStruct((NUM_CORE_SPLITS, tile_rows, LANES), jnp.float32),
        grid_spec=pltpu.PrefetchScalarGridSpec(
            num_scalar_prefetch=0,
            grid=(NUM_CORE_SPLITS, tiles_per_core),
            in_specs=[pl.BlockSpec((tile_rows, LANES), in_map)] * 4,
            out_specs=pl.BlockSpec((None, tile_rows, LANES), lambda c, i: (c, 0, 0)),
        ),
        compiler_params=pltpu.CompilerParams(
            dimension_semantics=("parallel", "arbitrary"),
            vmem_limit_bytes=32 * 1024 * 1024),
        cost_estimate=pl.CostEstimate(
            flops=20 * b_pad,
            transcendentals=0,
            bytes_accessed=bytes_in + 4 * out_elems),
    )(*ins)

    # Final tiny reduce + single 0.5/B scale in the wrapper (covers both cores'
    # partial-sum blocks).
    return jnp.sum(partials) * (0.5 / float(b))


def _reference_loss(distance, aux_distance, y, aux_y):
    def contrastive(d, lbl):
        d = d.astype(jnp.float32)
        lbl = lbl.astype(jnp.float32)
        pos = lbl * d * d
        neg = (1.0 - lbl) * jnp.square(jnp.maximum(MARGIN - d, 0.0))
        return 0.5 * jnp.mean(pos + neg)

    return contrastive(distance, y) + AUX_WEIGHT * contrastive(aux_distance, aux_y)


if __name__ == "__main__":
    key = jax.random.PRNGKey(0)
    k = jax.random.split(key, 16)

    def make(bi, k0, k1, k2, k3):
        d = jax.random.uniform(k0, (bi,), jnp.float32, 0.0, 2.0)
        ad = jax.random.uniform(k1, (bi,), jnp.float32, 0.0, 2.0)
        yy = jax.random.bernoulli(k2, 0.5, (bi,)).astype(jnp.float32)
        ayy = jax.random.bernoulli(k3, 0.5, (bi,)).astype(jnp.float32)
        return d, ad, yy, ayy

    # Small batch: single tile, pad + in-kernel tail mask.
    B = 8
    d, ad, yv, ayv = make(B, k[0], k[1], k[2], k[3])
    loss = inception_v3_loss(d, ad, yv, ayv)
    jax.block_until_ready(loss)
    ref = _reference_loss(d, ad, yv, ayv)
    assert jnp.allclose(loss, ref, rtol=1e-5, atol=1e-6), (loss, ref)

    # B % 1024 == 0: copy-free reshape, multi-tile reduction on both grid halves.
    B2 = 4096
    d2, ad2, y2, ay2 = make(B2, k[4], k[5], k[6], k[7])
    loss2 = inception_v3_loss(d2, ad2, y2, ay2, max_tile_rows=8)
    jax.block_until_ready(loss2)
    ref2 = _reference_loss(d2, ad2, y2, ay2)
    assert jnp.allclose(loss2, ref2, rtol=1e-5, atol=1e-5), (loss2, ref2)

    # Odd tile count + partial last tile: exercises index clamp + full masking.
    B3 = 5120
    d3, ad3, y3, ay3 = make(B3, k[8], k[9], k[10], k[11])
    loss3 = inception_v3_loss(d3, ad3, y3, ay3, max_tile_rows=16)
    jax.block_until_ready(loss3)
    ref3 = _reference_loss(d3, ad3, y3, ay3)
    assert jnp.allclose(loss3, ref3, rtol=1e-5, atol=1e-5), (loss3, ref3)

    # Ragged batch (B % 128 != 0): minimal pad + in-kernel mask.
    B4 = 1000
    d4, ad4, y4, ay4 = make(B4, k[12], k[13], k[14], k[15])
    loss4 = inception_v3_loss(d4, ad4, y4, ay4)
    jax.block_until_ready(loss4)
    ref4 = _reference_loss(d4, ad4, y4, ay4)
    assert jnp.allclose(loss4, ref4, rtol=1e-5, atol=1e-5), (loss4, ref4)

    print("KERNEL_OK")
</pallas_src>

<mosaic_0001>
module attributes {stable_mosaic.version = 11 : i64} {
  func.func @_loss_kernel(%arg0: i32, %arg1: i32, %arg2: memref<8x128xf32, #tpu.memory_space<vmem>>, %arg3: memref<8x128xf32, #tpu.memory_space<vmem>>, %arg4: memref<8x128xf32, #tpu.memory_space<vmem>>, %arg5: memref<8x128xf32, #tpu.memory_space<vmem>>, %arg6: memref<1x8x128xf32, #tpu.memory_space<vmem>>) attributes {dimension_semantics = [#tpu.dimension_semantics<parallel>, #tpu.dimension_semantics<arbitrary>], iteration_bounds = array<i64: 2, 1>, scalar_prefetch = 0 : i64, scratch_operands = 0 : i64, tpu.core_type = #tpu.core_type<tc>, window_params = [{transform_indices = @transform_0, window_bounds = array<i64: 8, 128>}, {transform_indices = @transform_1, window_bounds = array<i64: 8, 128>}, {transform_indices = @transform_2, window_bounds = array<i64: 8, 128>}, {transform_indices = @transform_3, window_bounds = array<i64: 8, 128>}, {transform_indices = @transform_4, window_bounds = array<i64: 1, 8, 128>}]} {
    %c0_i32 = arith.constant 0 : i32
    %0 = arith.cmpi eq, %arg1, %c0_i32 : i32
    %1 = arith.extui %0 : i1 to i32
    %c0_i32_0 = arith.constant 0 : i32
    %2 = arith.cmpi ne, %1, %c0_i32_0 : i32
    scf.if %2 {
      %cst_21 = arith.constant 0.000000e+00 : f32
      %52 = vector.broadcast %cst_21 : f32 to vector<8x128xf32>
      %c0_22 = arith.constant 0 : index
      %c0_23 = arith.constant 0 : index
      %c0_24 = arith.constant 0 : index
      %53 = vector.load %arg6[%c0_22, %c0_23, %c0_24] : memref<1x8x128xf32, #tpu.memory_space<vmem>>, vector<1x8x128xf32>
      %54 = vector.shape_cast %53 : vector<1x8x128xf32> to vector<8x128xf32>
      %55 = vector.shape_cast %52 : vector<8x128xf32> to vector<1x8x128xf32>
      tpu.vector_store %arg6[%c0_22, %c0_23, %c0_24], %55 {strides = array<i32>} : memref<1x8x128xf32, #tpu.memory_space<vmem>>, vector<1x8x128xf32>,
    } else {
    }
    %c0 = arith.constant 0 : index
    %c0_1 = arith.constant 0 : index
    %3 = vector.load %arg2[%c0, %c0_1] : memref<8x128xf32, #tpu.memory_space<vmem>>, vector<8x128xf32>
    %c0_2 = arith.constant 0 : index
    %c0_3 = arith.constant 0 : index
    %4 = vector.load %arg3[%c0_2, %c0_3] : memref<8x128xf32, #tpu.memory_space<vmem>>, vector<8x128xf32>
    %c0_4 = arith.constant 0 : index
    %c0_5 = arith.constant 0 : index
    %5 = vector.load %arg4[%c0_4, %c0_5] : memref<8x128xf32, #tpu.memory_space<vmem>>, vector<8x128xf32>
    %c0_6 = arith.constant 0 : index
    %c0_7 = arith.constant 0 : index
    %6 = vector.load %arg5[%c0_6, %c0_7] : memref<8x128xf32, #tpu.memory_space<vmem>>, vector<8x128xf32>
    %cst = arith.constant 1.000000e+00 : f32
    %7 = vector.broadcast %cst : f32 to vector<8x128xf32>
    %8 = arith.subf %7, %3 : vector<8x128xf32>
    %cst_8 = arith.constant 0.000000e+00 : f32
    %9 = vector.broadcast %cst_8 : f32 to vector<8x128xf32>
    %10 = arith.maximumf %8, %9 : vector<8x128xf32>
    %cst_9 = arith.constant 1.000000e+00 : f32
    %11 = vector.broadcast %cst_9 : f32 to vector<8x128xf32>
    %12 = arith.subf %11, %4 : vector<8x128xf32>
    %cst_10 = arith.constant 0.000000e+00 : f32
    %13 = vector.broadcast %cst_10 : f32 to vector<8x128xf32>
    %14 = arith.maximumf %12, %13 : vector<8x128xf32>
    %15 = arith.mulf %5, %3 : vector<8x128xf32>
    %16 = arith.mulf %15, %3 : vector<8x128xf32>
    %cst_11 = arith.constant 1.000000e+00 : f32
    %17 = vector.broadcast %cst_11 : f32 to vector<8x128xf32>
    %18 = arith.subf %17, %5 : vector<8x128xf32>
    %19 = arith.mulf %18, %10 : vector<8x128xf32>
    %20 = arith.mulf %19, %10 : vector<8x128xf32>
    %21 = arith.addf %16, %20 : vector<8x128xf32>
    %22 = arith.mulf %6, %4 : vector<8x128xf32>
    %23 = arith.mulf %22, %4 : vector<8x128xf32>
    %cst_12 = arith.constant 1.000000e+00 : f32
    %24 = vector.broadcast %cst_12 : f32 to vector<8x128xf32>
    %25 = arith.subf %24, %6 : vector<8x128xf32>
    %26 = arith.mulf %25, %14 : vector<8x128xf32>
    %27 = arith.mulf %26, %14 : vector<8x128xf32>
    %28 = arith.addf %23, %27 : vector<8x128xf32>
    %cst_13 = arith.constant 4.000000e-01 : f32
    %29 = vector.broadcast %cst_13 : f32 to vector<8x128xf32>
    %30 = arith.mulf %29, %28 : vector<8x128xf32>
    %31 = arith.addf %21, %30 : vector<8x128xf32>
    %c1_i32 = arith.constant 1 : i32
    %32 = arith.muli %arg0, %c1_i32 : i32
    %33 = arith.addi %32, %arg1 : i32
    %c1024_i32 = arith.constant 1024 : i32
    %34 = arith.muli %33, %c1024_i32 : i32
    %35 = tpu.iota {dimensions = array<i32: 0>} : vector<8x128xi32>
    %36 = tpu.iota {dimensions = array<i32: 1>} : vector<8x128xi32>
    %c128_i32 = arith.constant 128 : i32
    %37 = vector.broadcast %c128_i32 : i32 to vector<8x128xi32>
    %38 = arith.muli %35, %37 : vector<8x128xi32>
    %39 = vector.broadcast %34 : i32 to vector<8x128xi32>
    %40 = arith.addi %39, %38 : vector<8x128xi32>
    %41 = arith.addi %40, %36 : vector<8x128xi32>
    %c8_i32 = arith.constant 8 : i32
    %42 = vector.broadcast %c8_i32 : i32 to vector<8x128xi32>
    %43 = arith.cmpi slt, %41, %42 : vector<8x128xi32>
    %c0_14 = arith.constant 0 : index
    %c0_15 = arith.constant 0 : index
    %c0_16 = arith.constant 0 : index
    %44 = vector.load %arg6[%c0_14, %c0_15, %c0_16] : memref<1x8x128xf32, #tpu.memory_space<vmem>>, vector<1x8x128xf32>
    %45 = vector.shape_cast %44 : vector<1x8x128xf32> to vector<8x128xf32>
    %cst_17 = arith.constant 0.000000e+00 : f32
    %46 = vector.broadcast %cst_17 : f32 to vector<8x128xf32>
    %47 = arith.select %43, %31, %46 : vector<8x128xi1>, vector<8x128xf32>
    %48 = arith.addf %45, %47 : vector<8x128xf32>
    %c0_18 = arith.constant 0 : index
    %c0_19 = arith.constant 0 : index
    %c0_20 = arith.constant 0 : index
    %49 = vector.load %arg6[%c0_18, %c0_19, %c0_20] : memref<1x8x128xf32, #tpu.memory_space<vmem>>, vector<1x8x128xf32>
    %50 = vector.shape_cast %49 : vector<1x8x128xf32> to vector<8x128xf32>
    %51 = vector.shape_cast %48 : vector<8x128xf32> to vector<1x8x128xf32>
    tpu.vector_store %arg6[%c0_18, %c0_19, %c0_20], %51 {strides = array<i32>} : memref<1x8x128xf32, #tpu.memory_space<vmem>>, vector<1x8x128xf32>,
    return
  }
  func.func @transform_0(%arg0: i32, %arg1: i32) -> (i32, i32) {
    %c1_i32 = arith.constant 1 : i32
    %0 = arith.muli %arg0, %c1_i32 : i32
    %1 = arith.addi %0, %arg1 : i32
    %c0_i32 = arith.constant 0 : i32
    %2 = arith.minsi %1, %c0_i32 : i32
    %c0_i32_0 = arith.constant 0 : i32
    %c0_i32_1 = arith.constant 0 : i32
    return %2, %c0_i32_0 : i32, i32
  }
  func.func @transform_1(%arg0: i32, %arg1: i32) -> (i32, i32) {
    %c1_i32 = arith.constant 1 : i32
    %0 = arith.muli %arg0, %c1_i32 : i32
    %1 = arith.addi %0, %arg1 : i32
    %c0_i32 = arith.constant 0 : i32
    %2 = arith.minsi %1, %c0_i32 : i32
    %c0_i32_0 = arith.constant 0 : i32
    %c0_i32_1 = arith.constant 0 : i32
    return %2, %c0_i32_0 : i32, i32
  }
  func.func @transform_2(%arg0: i32, %arg1: i32) -> (i32, i32) {
    %c1_i32 = arith.constant 1 : i32
    %0 = arith.muli %arg0, %c1_i32 : i32
    %1 = arith.addi %0, %arg1 : i32
    %c0_i32 = arith.constant 0 : i32
    %2 = arith.minsi %1, %c0_i32 : i32
    %c0_i32_0 = arith.constant 0 : i32
    %c0_i32_1 = arith.constant 0 : i32
    return %2, %c0_i32_0 : i32, i32
  }
  func.func @transform_3(%arg0: i32, %arg1: i32) -> (i32, i32) {
    %c1_i32 = arith.constant 1 : i32
    %0 = arith.muli %arg0, %c1_i32 : i32
    %1 = arith.addi %0, %arg1 : i32
    %c0_i32 = arith.constant 0 : i32
    %2 = arith.minsi %1, %c0_i32 : i32
    %c0_i32_0 = arith.constant 0 : i32
    %c0_i32_1 = arith.constant 0 : i32
    return %2, %c0_i32_0 : i32, i32
  }
  func.func @transform_4(%arg0: i32, %arg1: i32) -> (i32, i32, i32) {
    %c0_i32 = arith.constant 0 : i32
    %c0_i32_0 = arith.constant 0 : i32
    %c0_i32_1 = arith.constant 0 : i32
    return %arg0, %c0_i32, %c0_i32_0 : i32, i32, i32
  }
}

</mosaic_0001>

<bundles_post_ra>
// kernel: tpu_custom_call.1
= control target key start
LH: loop header
LB: loop body
LE: loop exit
PB: predicated region body
PF: predicated region fallthrough
CT: control target
= control target key end

     0   :  { %s1181_s0 = inlined_call_operand.hbm [shape: f32[8,128], index: 0, kind: input, shape index: {}]   ;;  %s1182_s1 = inlined_call_operand.hbm [shape: f32[8,128], index: 1, kind: input, shape index: {}]   ;;  %s1183_s2 = inlined_call_operand.hbm [shape: f32[8,128], index: 2, kind: input, shape index: {}]   ;;  %s1184_s3 = inlined_call_operand.hbm [shape: f32[8,128], index: 3, kind: input, shape index: {}]   ;;  %s1185_s4 = inlined_call_operand.hbm [shape: f32[2,8,128], index: 4, kind: output, shape index: {}]  }
   0x1   :  { %1188 = sst [smem:[#allocation17_spill]] %s1182_s1 }
   0x2   :  { %9 = vsyncpa [#allocation3], 0 }
   0x3   :  { %11 = vsyncpa [#allocation3 + $0x1], 0 }
   0x4   :  { %12 = vsyncpa [#allocation6], 0 }
   0x5   :  { %14 = vsyncpa [#allocation6 + $0x1], 0 }
   0x6   :  { %15 = vsyncpa [#allocation9], 0 }
   0x7   :  { %17 = vsyncpa [#allocation9 + $0x1], 0 }
   0x8   :  { %18 = vsyncpa [#allocation4], 0 }
   0x9   :  { %20 = vsyncpa [#allocation4 + $0x1], 0  ;;  %s978_s15 = smov 0   ;;  %s980_s16 = smov 0  }
   0xa   :  { %s982_s17 = smov 0   ;;  %s984_s18 = smov 0  }
   0xb   :  { %s986_s19 = smov 0   ;;  %s988_s20 = smov 0  }
   0xc   :  { %s990_s21 = smov 0   ;;  %s992_s22 = smov 0  }
   0xd LB: > { %1189 = sst [smem:[#allocation15_spill]] %s943_s21  ;;  %s1017_s23 = sadd.s32 4294967295, %s947_s22   ;;  %s947_s22 = sphi %s992_s22, %s26_s22   ;;  %s943_s21 = sphi %s990_s21, %s1199_s21   ;;  %s939_s20 = sphi %s988_s20, %s1198_s20   ;;  %s935_s19 = sphi %s986_s19, %s1171_s19   ;;  %s931_s18 = sphi %s984_s18, %s1203_s18   ;;  %s927_s17 = sphi %s982_s17, %s1202_s17   ;;  %s923_s16 = sphi %s980_s16, %s1201_s16   ;;  %s919_s15 = sphi %s978_s15, %s1200_s15  }
   0xe   : > { %s592_s24 = sadd.s32 4294967294, %s947_s22   ;;  %s38_s25 = sadd.s32 1, %s943_s21 }
   0xf   : > { %p40_p0 = scmp.ge.s32.totalorder %s38_s25, 2  ;;  %p916_p1 = scmp.ne.s32.totalorder %s935_s19, 0 }
  0x10   : > { %p59_p2 = scmp.eq.s32.totalorder %s947_s22, 0  ;;  %p64_p3 = scmp.ne.s32.totalorder %s935_s19, %s931_s18 }
  0x11   : > { %s1205_s25 = smov (%p40_p0, %s38_s25), 0  ;;  %p65_p5 = scmp.eq.s32.totalorder %s1017_s23, 0 }
  0x12   : > { %1190 = sst [smem:[#allocation16_spill]] %s1205_s25  ;;  %p1026_p4 = por %p916_p1, %p59_p2 }
  0x13   : > { %p1031_p6 = por %p65_p5, %p64_p3  ;;  %s170_s28 = ssub.s32 %s943_s21, %s1205_s25 }
  0x14   : > { %p171_p7 = scmp.eq.s32.totalorder %s170_s28, 0  ;;  %s173_s29 = sadd.s32 1, %s927_s17 }
  0x15   : > { %p183_p8 = scmp.ne.s32.totalorder %s927_s17, %s923_s16  ;;  %p184_p9 = scmp.eq.s32.totalorder %s1017_s23, 1 }
  0x16   : > { %s1039_s30 = scalar_select %p171_p7, %s927_s17, %s173_s29  }
  0x17   : > { %p189_p10 = scmp.ne.s32.totalorder %s923_s16, %s919_s15  ;;  %p190_p11 = scmp.eq.s32.totalorder %s592_s24, 1 }
  0x18   : > { %p1046_p12 = por %p184_p9, %p183_p8  ;;  %p594_p13 = scmp.ge.s32.totalorder %s947_s22, 2 }
  0x19   : > { %p1051_p0 = por %p190_p11, %p189_p10  ;;  %p641_p1 = scmp.lt.s32.totalorder %s947_s22, 2 }
  0x1a   : > { %s232_s8 = sand.u32 1, %s947_s22   ;;  %s949_s9 = smov [#allocation5]  }
  0x1b   : > { %p1058_p2 = pnand %p641_p1, %p1026_p4  ;;  %s247_s10 = sshll.u32 %s949_s9, 4  ;;  %s248_s10 = int_to_ptr.vmem [resolvable:$true] %s247_s10 }
  0x1c   : > { %s1196_s1 = sld [smem:[#allocation17_spill]]  ;;  %p603_p3 = scmp.ge.s32.totalorder %s947_s22, 1 }
  0x1d   : > { %s1067_s14 = scalar_lea.sflag [#allocation6], %s232_s8  ;;  %p720_p5 = pneg %p1058_p2 }
  0x22   : > { %s245_s13 = sshll.u32 %s1196_s1, 4  ;;  %s723_s29 = scalar_lea.hbm %s1196_s1, 8  ;;  %s246_s13 = int_to_ptr.hbm [resolvable:$true] %s245_s13 }
  0x23   : > { %s716_s18 = sshra.s32 %s246_s13, 4  ;;  %s717_s18 = int_to_ptr.hbm [resolvable:$true] %s716_s18 }
  0x24   : > { %s718_s24 = scalar_lea.hbm %s717_s18, 8 }
  0x25   : > { %p719_p4 = scmp.ne.s32.totalorder %s717_s18, %s718_s24  ;;  %p725_p9 = scmp.lt.s32.totalorder %s723_s29, %s718_s24 }
  0x27   : > { %p721_p7 = pnand %p720_p5, %p719_p4 }
  0x29   : > { %p722_p8 = pneg %p721_p7 }
  0x2b   : > { %p727_p10 = pnand %p725_p9, %p722_p8 }
  0x2d   : > { %730 = shalt.err (!%p727_p10)
}
  0x2e   : > { %630 = dma.hbm_to_vmem [thread:$0]  (!%p1058_p2), %s246_s13, 128, %s248_s10, %s1067_s14  }
  0x2f   : > { %p296_p11 = scmp.lt.s32.totalorder %s947_s22, 3  ;;  %s950_s9 = smov [#allocation2]  }
  0x30   : > { %s225_s11 = sshll.u32 %s950_s9, 4  ;;  %s223_s24 = sshll.u32 %s1181_s0, 4  ;;  %s226_s11 = int_to_ptr.vmem [resolvable:$true] %s225_s11  ;;  %s224_s24 = int_to_ptr.hbm [resolvable:$true] %s223_s24 }
  0x31   : > { %p1083_p1 = pnand %p603_p3, %p296_p11  ;;  %s746_s26 = sshra.s32 %s224_s24, 4  ;;  %s747_s26 = int_to_ptr.hbm [resolvable:$true] %s746_s26 }
  0x32   : > { %s748_s28 = scalar_lea.hbm %s747_s26, 8  ;;  %s753_s29 = scalar_lea.hbm %s1181_s0, 8 }
  0x33   : > { %p749_p4 = scmp.ne.s32.totalorder %s747_s26, %s748_s28  ;;  %p755_p3 = scmp.lt.s32.totalorder %s753_s29, %s748_s28 }
  0x35   : > { %p751_p7 = pnand %p749_p4, %p720_p5 }
  0x37   : > { %p752_p8 = pneg %p751_p7 }
  0x39   : > { %p757_p9 = pnand %p755_p3, %p752_p8 }
  0x3b   : > { %760 = shalt.err (!%p757_p9)
}
  0x3c   : > { %627 = dma.hbm_to_vmem [thread:$0]  (!%p1058_p2), %s224_s24, 128, %s226_s11, [#allocation3]  }
  0x3d   : > { %s951_s9 = smov [#allocation7]   ;;  %s267_s26 = sshll.u32 %s1183_s2, 4  ;;  %s268_s26 = int_to_ptr.hbm [resolvable:$true] %s267_s26 }
  0x3e   : > { %s269_s12 = sshll.u32 %s951_s9, 4  ;;  %s776_s25 = sshra.s32 %s268_s26, 4  ;;  %s270_s12 = int_to_ptr.vmem [resolvable:$true] %s269_s12  ;;  %s777_s25 = int_to_ptr.hbm [resolvable:$true] %s776_s25 }
  0x3f   : > { %s778_s21 = scalar_lea.hbm %s777_s25, 8  ;;  %s783_s11 = scalar_lea.hbm %s1183_s2, 8 }
  0x40   : > { %p779_p10 = scmp.ne.s32.totalorder %s777_s25, %s778_s21  ;;  %p785_p7 = scmp.lt.s32.totalorder %s783_s11, %s778_s21 }
  0x42   : > { %p781_p11 = pnand %p779_p10, %p720_p5 }
  0x44   : > { %p782_p4 = pneg %p781_p11 }
  0x46   : > { %p787_p8 = pnand %p785_p7, %p782_p4 }
  0x48   : > { %790 = shalt.err (!%p787_p8)
}
  0x49   : > { %633 = dma.hbm_to_vmem [thread:$0]  (!%p1058_p2), %s268_s26, 128, %s270_s12, %s1067_s14  }
  0x4a   : > { %s289_s25 = sshll.u32 %s1184_s3, 4  ;;  %s952_s13 = smov [#allocation8]   ;;  %s290_s25 = int_to_ptr.hbm [resolvable:$true] %s289_s25 }
  0x4b   : > { %s291_s29 = sshll.u32 %s952_s13, 4  ;;  %s806_s9 = sshra.s32 %s290_s25, 4  ;;  %s292_s29 = int_to_ptr.vmem [resolvable:$true] %s291_s29  ;;  %s807_s9 = int_to_ptr.hbm [resolvable:$true] %s806_s9 }
  0x4c   : > { %s808_s18 = scalar_lea.hbm %s807_s9, 8  ;;  %s813_s14 = scalar_lea.hbm %s1184_s3, 8 }
  0x4d   : > { %p809_p3 = scmp.ne.s32.totalorder %s807_s9, %s808_s18  ;;  %p815_p11 = scmp.lt.s32.totalorder %s813_s14, %s808_s18 }
  0x4f   : > { %p811_p9 = pnand %p809_p3, %p720_p5 }
  0x51   : > { %p812_p10 = pneg %p811_p9 }
  0x53   : > { %p817_p4 = pnand %p815_p11, %p812_p10 }
  0x55   : > { %820 = shalt.err (!%p817_p4)
}
  0x56   : > { %636 = dma.hbm_to_vmem [thread:$0]  (!%p1058_p2), %s290_s25, 128, %s292_s29, [#allocation9]  }
  0x57   : > { %300 = sbr.rel (%p1083_p1) target bundleno = 118 (0x76), region = 36  ;;  %s302_s12 = sand.u32 (!%p1083_p1), 1, %s935_s19  }
  0x58   : > { %s604_s26 = sshll.u32 (!%p1083_p1), %s302_s12, 3  ;;  %s303_s10 = scalar_lea.sflag (!%p1083_p1), [#allocation3], %s302_s12 }
  0x59   : > { %s306_s11 = scalar_lea.vmem (!%p1083_p1), [#allocation2], %s604_s26 }
  0x5c   : > { %901 = dma.done.wait (%p1031_p6), %s303_s10, 128  }
  0x5d   : > { %903 = vsyncadd (%p1031_p6), %s303_s10, 4294967168  ;;  %s312_s1 = sand.u32 1, %s1017_s23   ;;  %s316_s7 = scalar_lea.vmem [#allocation5], %s604_s26 }
  0x5e   : > { %s313_s24 = scalar_lea.sflag [#allocation6], %s312_s1 }
  0x5f   : > { %905 = dma.done.wait (%p1031_p6), %s313_s24, 256  }
  0x60   : > { %907 = vsyncadd (%p1031_p6), %s313_s24, 4294967040  ;;  %s326_s8 = scalar_lea.vmem [#allocation7], %s604_s26  ;;  %s333_s25 = scalar_lea.sflag [#allocation9], %s302_s12 }
  0x61   : > { %s336_s13 = scalar_lea.vmem [#allocation8], %s604_s26 }
  0x62   : > { %909 = dma.done.wait (%p1031_p6), %s333_s25, 128  }
  0x63   : > { %911 = vsyncadd (%p1031_p6), %s333_s25, 4294967168  ;;  %v418_v0 = vlaneseq  ;;  %s609_s23 = sshll.u32 %s939_s20, 10  ;;  %v394_v2 = vld [vmem:[%s306_s11] sm:$0xff]  ;;  %v395_v3 = vld [vmem:[%s316_s7] sm:$0xff]  ;;  %s374_s27 = sand.u32 1, %s923_s16  }
  0x64   : > { %v396_v4 = vld [vmem:[%s326_s8] sm:$0xff]  ;;  %v423_v6 = vstv %s609_s23  ;;  %v397_v7 = vld [vmem:[%s336_s13] sm:$0xff]  ;;  %v398_v8 = vsub.f32 1.0, %v394_v2  ;;  %v400_v9 = vsub.f32 1.0, %v395_v3  ;;  %s608_s29 = sshll.u32 %s374_s27, 3  ;;  %s611_s9 = sshll.u32 %s939_s20, 3 }
  0x65   : > { %v419_v1 = vshrl.u32 %v418_v0, 7  ;;  %v402_v10 = vmul.f32 %v396_v4, %v394_v2  ;;  %v404_v11 = vsub.f32 1.0, %v396_v4  ;;  %v408_v12 = vmul.f32 %v397_v7, %v395_v3  ;;  %s442_s28 = scalar_lea.hbm %s1185_s4, %s611_s9  ;;  %s376_s14 = scalar_lea.vmem [#allocation10], %s608_s29 }
  0x66   : > { %v410_v13 = vsub.f32 1.0, %v397_v7  ;;  %v399_v14 = vmax.f32 %v398_v8, 0.0  ;;  %v401_v15 = vmax.f32 %v400_v9, 0.0  ;;  %v421_v16 = vand.u32 127, %v418_v0  ;;  %s444_s12 = sshll.u32 %s376_s14, 4  ;;  %s446_s26 = sshll.u32 %s442_s28, 4  ;;  %s445_s12 = int_to_ptr.vmem [resolvable:$true] %s444_s12  ;;  %s447_s26 = int_to_ptr.hbm [resolvable:$true] %s446_s26 }
  0x67   : > { %v422_v5 = vmul.u32 128, %v419_v1  ;;  %v403_v18 = vmul.f32 %v402_v10, %v394_v2  ;;  %v409_v20 = vmul.f32 %v408_v12, %v395_v3  ;;  %s432_s10 = scalar_lea.sflag [#allocation4], %s374_s27  ;;  %s850_s20 = sshra.s32 %s447_s26, 4  ;;  %s851_s20 = int_to_ptr.hbm [resolvable:$true] %s850_s20 }
  0x68   : > { %v405_v19 = vmul.f32 %v404_v11, %v399_v14  ;;  %v411_v21 = vmul.f32 %v410_v13, %v401_v15  ;;  %s852_s11 = scalar_lea.hbm %s851_s20, 8  ;;  %s856_s7 = scalar_lea.hbm %s1185_s4, 16 }
  0x69   : > { %v424_v17 = vadd.s32 %v423_v6, %v422_v5  ;;  %p853_p6 = scmp.ne.s32.totalorder %s851_s20, %s852_s11  ;;  %p857_p1 = scmp.lt.s32.totalorder %s851_s20, %s1185_s4 }
  0x6a   : > { %v406_v22 = vmul.f32 %v405_v19, %v399_v14  ;;  %v412_v23 = vmul.f32 %v411_v21, %v401_v15  ;;  %p858_p7 = scmp.lt.s32.totalorder %s856_s7, %s852_s11 }
  0x6b   : > { %v425_v24 = vadd.s32 %v424_v17, %v421_v16  ;;  %p854_p2 = pnand %p853_p6, %p1046_p12 }
  0x6c   : > { %v407_v25 = vadd.f32 %v406_v22, %v403_v18  ;;  %v413_v26 = vadd.f32 %v412_v23, %v409_v20  ;;  %p859_p8 = por %p858_p7, %p857_p1 }
  0x6d   : > { %vm426_vm0 = vcmp.lt.s32.totalorder %v425_v24, 8  ;;  %p855_p5 = pneg %p854_p2 }
  0x6e   : > { %v414_v27 = vmul.f32 0.4, %v413_v26 }
  0x6f   : > { %p860_p3 = pnand %p859_p8, %p855_p5 }
  0x70   : > { %v415_v28 = vadd.f32 %v414_v27, %v407_v25 }
  0x72   : > { %v428_v29 = vsel %vm426_vm0, %v415_v28, 0.0 }
  0x73   : > { %430 = vst [vmem:[%s376_s14] sm:$0xff] %v428_v29 }
  0x74   : > { %863 = shalt.err (!%p860_p3)
}
  0x75   : > { %622 = dma.vmem_to_hbm [thread:$0]  (%p1046_p12), %s445_s12, 128, %s447_s26, %s432_s10  }
  0x76 PF: > { %s458_s13 = sand.u32 1, %s919_s15   ;;  %p638_p9 = pnand %p594_p13, %p1051_p0 }
  0x77   : > { %s459_s23 = scalar_lea.sflag [#allocation4], %s458_s13 }
  0x78   : > { %p639_p10 = pneg %p638_p9 }
  0x7a   : > { %913 = dma.done.wait (%p639_p10), %s459_s23, 128  }
  0x7b   : > { %915 = vsyncadd (%p639_p10), %s459_s23, 4294967168  ;;  %s26_s22 = sadd.s32 1, %s947_s22   ;;  %s1198_s20 = sld [smem:[#allocation15_spill]] }
  0x7c   : > { %p23_p11 = scmp.ge.s32.totalorder %s26_s22, 4   ;;  %s1199_s21 = sld [smem:[#allocation16_spill]] }
  0x7d   : > { %s1200_s15 = smov %s923_s16  ;;  %s1201_s16 = smov %s927_s17 }
  0x7e   : > { %s1202_s17 = smov %s1039_s30  ;;  %s1203_s18 = smov %s935_s19 }
  0x7f   : > { %s1171_s19 = smov 0   ;;  %25 = sbr.rel (!%p23_p11) target bundleno = 13 (0xd), region = 122 }
  0x84   :  { %465 = vsyncpa [#allocation3], 1 }
  0x85   :  { %467 = vsyncpa [#allocation3 + $0x1], 1 }
  0x86   :  { %468 = vsyncpa [#allocation6], 1 }
  0x87   :  { %470 = vsyncpa [#allocation6 + $0x1], 1 }
  0x88   :  { %471 = vsyncpa [#allocation9], 1 }
  0x89   :  { %473 = vsyncpa [#allocation9 + $0x1], 1 }
  0x8a   :  { %474 = vsyncpa [#allocation4], 1 }
  0x8b   :  { %476 = vsyncpa [#allocation4 + $0x1], 1 }

</bundles_post_ra>
